<compile_context>
chip_gen: v7x
topology: tpu7x:2x2x1
jax: 0.10.0
libtpu: 0.0.40
codegen_flags: <defaults>
</compile_context>

<pallas_src>
import functools

import jax
import jax.numpy as jnp
from jax import lax
from jax.experimental import pallas as pl
from jax.experimental.pallas import tpu as pltpu

_LANES = 128
_NCORES = 2            # megacore split (v7x); pure sequential loop elsewhere
_MAX_ROWS_TILE = 1024  # 1024 x 128 f32 = 0.5 MiB per input tile (fits v5e/v6e/v7x budgets)


def _bce_focal_kernel(x_ref, t_ref, o_ref, acc_ref, *, alpha, gamma,
                      rows_tile, tiles_per_core, total_elems):
    c = pl.program_id(0)           # "core" / parallel axis
    i = pl.program_id(1)           # reduction axis (row-tiles handled by this core)

    @pl.when(i == 0)
    def _():
        acc_ref[...] = jnp.zeros_like(acc_ref)

    x = x_ref[...].astype(jnp.float32)
    t = t_ref[...].astype(jnp.float32)

    # Stable sigmoid / log-sigmoid sharing one exp (3 EUP ops total).
    e = jnp.exp(-jnp.abs(x))                       # exp
    log_pt = jnp.minimum(x, 0.0) - jnp.log(1.0 + e)  # log(sigmoid(x))    (log)
    log_1mpt = log_pt - x                          # log(1 - sigmoid(x))
    pt = jnp.exp(log_pt)                           # sigmoid(x)           (exp)
    omp = 1.0 - pt

    if gamma == 2:                                  # integer gamma -> explicit squaring
        w_pos = omp * omp
        w_neg = pt * pt
    else:                                           # general gamma fallback
        w_pos = omp ** gamma
        w_neg = pt ** gamma

    loss = (-alpha * w_pos * t * log_pt
            - (1.0 - alpha) * w_neg * (1.0 - t) * log_1mpt)

    # Mask padded / overhanging elements by their global flat index.
    tile_idx = c * tiles_per_core + i
    row_ids = lax.broadcasted_iota(jnp.int32, (rows_tile, _LANES), 0)
    lane_ids = lax.broadcasted_iota(jnp.int32, (rows_tile, _LANES), 1)
    flat_idx = (tile_idx * rows_tile + row_ids) * _LANES + lane_ids
    loss = jnp.where(flat_idx < total_elems, loss, 0.0)

    # Vector accumulator: plain VPU add per step, no per-step cross-lane reduce.
    acc_ref[...] += loss

    @pl.when(i == pl.num_programs(1) - 1)
    def _():
        # Fold (rows_tile, 128) down to one lane-dense (8, 128) partial-sum block.
        o_ref[...] = acc_ref[...].reshape(rows_tile // 8, 8, _LANES).sum(axis=0)


def bce_focal_loss(logits, targets, gamma=2, alpha=0.25, reduction="elementwise_mean"):
    assert logits.shape == targets.shape
    total = int(logits.size)

    # Flatten to [rows, 128]; pad by at most 127 elements (only if size not 128-aligned).
    rows = -(-total // _LANES)
    padded_total = rows * _LANES
    pad = padded_total - total

    xf = jnp.ravel(logits)
    tf = jnp.ravel(targets)
    if pad:
        xf = jnp.pad(xf, (0, pad))
        tf = jnp.pad(tf, (0, pad))
    x2 = xf.reshape(rows, _LANES)
    t2 = tf.reshape(rows, _LANES)

    rows_tile = max(8, min(_MAX_ROWS_TILE, ((rows + 7) // 8) * 8))
    n_blocks = -(-rows // rows_tile)               # row-tiles covering the array
    tiles_per_core = -(-n_blocks // _NCORES)

    kernel = functools.partial(
        _bce_focal_kernel,
        alpha=float(alpha),
        gamma=gamma,
        rows_tile=rows_tile,
        tiles_per_core=tiles_per_core,
        total_elems=total,
    )

    def in_map(c, i):
        # Clamp so fully-masked overhanging tiles still read a valid block.
        return (jnp.minimum(c * tiles_per_core + i, n_blocks - 1), 0)

    partials = pl.pallas_call(
        kernel,
        out_shape=jax.ShapeDtypeStruct((_NCORES * 8, _LANES), jnp.float32),
        grid_spec=pltpu.PrefetchScalarGridSpec(
            num_scalar_prefetch=0,
            grid=(_NCORES, tiles_per_core),
            in_specs=[
                pl.BlockSpec((rows_tile, _LANES), in_map),
                pl.BlockSpec((rows_tile, _LANES), in_map),
            ],
            out_specs=pl.BlockSpec((8, _LANES), lambda c, i: (c, 0)),
            scratch_shapes=[pltpu.VMEM((rows_tile, _LANES), jnp.float32)],
        ),
        compiler_params=pltpu.CompilerParams(
            dimension_semantics=("parallel", "arbitrary"),
        ),
    )(x2, t2)

    total_sum = jnp.sum(partials)
    if reduction == "elementwise_mean":
        return total_sum / jnp.float32(total)
    elif reduction == "sum":
        return total_sum
    else:
        # TODO(synk): reduction='none' (return full elementwise loss tensor) not implemented.
        raise NotImplementedError("only 'elementwise_mean' and 'sum' reductions are fused")


def _reference(logits, targets, gamma=2, alpha=0.25):
    # Mirrors the PyTorch module's naive formulation.
    pt = jax.nn.sigmoid(logits.astype(jnp.float32))
    t = targets.astype(jnp.float32)
    loss = (-alpha * (1 - pt) ** gamma * t * jnp.log(pt)
            - (1 - alpha) * pt ** gamma * (1 - t) * jnp.log(1 - pt))
    return jnp.mean(loss)


if __name__ == "__main__":
    key = jax.random.PRNGKey(0)
    k1, k2 = jax.random.split(key)
    # NCHW input consistent with a conv-net head: [2, 4, 16, 16]
    x = jax.random.normal(k1, (2, 4, 16, 16), dtype=jnp.float32)
    t = (jax.random.uniform(k2, (2, 4, 16, 16)) > 0.5).astype(jnp.float32)

    out = bce_focal_loss(x, t)
    out = jax.block_until_ready(out)

    ref = _reference(x, t)
    assert jnp.allclose(out, ref, rtol=1e-5, atol=1e-6), (out, ref)
    print("KERNEL_OK")
</pallas_src>

<mosaic_0001>
module attributes {stable_mosaic.version = 11 : i64} {
  func.func @_bce_focal_kernel(%arg0: i32, %arg1: i32, %arg2: memref<16x128xf32, #tpu.memory_space<vmem>>, %arg3: memref<16x128xf32, #tpu.memory_space<vmem>>, %arg4: memref<8x128xf32, #tpu.memory_space<vmem>>, %arg5: memref<16x128xf32, #tpu.memory_space<vmem>>) attributes {dimension_semantics = [#tpu.dimension_semantics<parallel>, #tpu.dimension_semantics<arbitrary>], iteration_bounds = array<i64: 2, 1>, scalar_prefetch = 0 : i64, scratch_operands = 1 : i64, tpu.core_type = #tpu.core_type<tc>, window_params = [{transform_indices = @transform_0, window_bounds = array<i64: 16, 128>}, {transform_indices = @transform_1, window_bounds = array<i64: 16, 128>}, {transform_indices = @transform_2, window_bounds = array<i64: 8, 128>}]} {
    %c0_i32 = arith.constant 0 : i32
    %0 = arith.cmpi eq, %arg1, %c0_i32 : i32
    %1 = arith.extui %0 : i1 to i32
    %c0_i32_0 = arith.constant 0 : i32
    %2 = arith.cmpi ne, %1, %c0_i32_0 : i32
    scf.if %2 {
      %cst_17 = arith.constant 0.000000e+00 : f32
      %52 = vector.broadcast %cst_17 : f32 to vector<16x128xf32>
      %c0_18 = arith.constant 0 : index
      %c0_19 = arith.constant 0 : index
      %53 = vector.load %arg5[%c0_18, %c0_19] : memref<16x128xf32, #tpu.memory_space<vmem>>, vector<16x128xf32>
      tpu.vector_store %arg5[%c0_18, %c0_19], %52 {strides = array<i32>} : memref<16x128xf32, #tpu.memory_space<vmem>>, vector<16x128xf32>,
    } else {
    }
    %c0 = arith.constant 0 : index
    %c0_1 = arith.constant 0 : index
    %3 = vector.load %arg2[%c0, %c0_1] : memref<16x128xf32, #tpu.memory_space<vmem>>, vector<16x128xf32>
    %c0_2 = arith.constant 0 : index
    %c0_3 = arith.constant 0 : index
    %4 = vector.load %arg3[%c0_2, %c0_3] : memref<16x128xf32, #tpu.memory_space<vmem>>, vector<16x128xf32>
    %5 = math.absf %3 : vector<16x128xf32>
    %cst = arith.constant 0.000000e+00 : f32
    %6 = vector.broadcast %cst : f32 to vector<16x128xf32>
    %7 = arith.subf %6, %5 : vector<16x128xf32>
    %8 = math.exp %7 : vector<16x128xf32>
    %cst_4 = arith.constant 0.000000e+00 : f32
    %9 = vector.broadcast %cst_4 : f32 to vector<16x128xf32>
    %10 = arith.minimumf %3, %9 : vector<16x128xf32>
    %cst_5 = arith.constant 1.000000e+00 : f32
    %11 = vector.broadcast %cst_5 : f32 to vector<16x128xf32>
    %12 = arith.addf %11, %8 : vector<16x128xf32>
    %13 = math.log %12 : vector<16x128xf32>
    %14 = arith.subf %10, %13 : vector<16x128xf32>
    %15 = arith.subf %14, %3 : vector<16x128xf32>
    %16 = math.exp %14 : vector<16x128xf32>
    %cst_6 = arith.constant 1.000000e+00 : f32
    %17 = vector.broadcast %cst_6 : f32 to vector<16x128xf32>
    %18 = arith.subf %17, %16 : vector<16x128xf32>
    %19 = arith.mulf %18, %18 : vector<16x128xf32>
    %20 = arith.mulf %16, %16 : vector<16x128xf32>
    %cst_7 = arith.constant -2.500000e-01 : f32
    %21 = vector.broadcast %cst_7 : f32 to vector<16x128xf32>
    %22 = arith.mulf %21, %19 : vector<16x128xf32>
    %23 = arith.mulf %22, %4 : vector<16x128xf32>
    %24 = arith.mulf %23, %14 : vector<16x128xf32>
    %cst_8 = arith.constant 7.500000e-01 : f32
    %25 = vector.broadcast %cst_8 : f32 to vector<16x128xf32>
    %26 = arith.mulf %25, %20 : vector<16x128xf32>
    %cst_9 = arith.constant 1.000000e+00 : f32
    %27 = vector.broadcast %cst_9 : f32 to vector<16x128xf32>
    %28 = arith.subf %27, %4 : vector<16x128xf32>
    %29 = arith.mulf %26, %28 : vector<16x128xf32>
    %30 = arith.mulf %29, %15 : vector<16x128xf32>
    %31 = arith.subf %24, %30 : vector<16x128xf32>
    %c1_i32 = arith.constant 1 : i32
    %32 = arith.muli %arg0, %c1_i32 : i32
    %33 = arith.addi %32, %arg1 : i32
    %34 = tpu.iota {dimensions = array<i32: 0>} : vector<16x128xi32>
    %35 = tpu.iota {dimensions = array<i32: 1>} : vector<16x128xi32>
    %c16_i32 = arith.constant 16 : i32
    %36 = arith.muli %33, %c16_i32 : i32
    %37 = vector.broadcast %36 : i32 to vector<16x128xi32>
    %38 = arith.addi %37, %34 : vector<16x128xi32>
    %c128_i32 = arith.constant 128 : i32
    %39 = vector.broadcast %c128_i32 : i32 to vector<16x128xi32>
    %40 = arith.muli %38, %39 : vector<16x128xi32>
    %41 = arith.addi %40, %35 : vector<16x128xi32>
    %c2048_i32 = arith.constant 2048 : i32
    %42 = vector.broadcast %c2048_i32 : i32 to vector<16x128xi32>
    %43 = arith.cmpi slt, %41, %42 : vector<16x128xi32>
    %cst_10 = arith.constant 0.000000e+00 : f32
    %44 = vector.broadcast %cst_10 : f32 to vector<16x128xf32>
    %45 = arith.select %43, %31, %44 : vector<16x128xi1>, vector<16x128xf32>
    %c0_11 = arith.constant 0 : index
    %c0_12 = arith.constant 0 : index
    %46 = vector.load %arg5[%c0_11, %c0_12] : memref<16x128xf32, #tpu.memory_space<vmem>>, vector<16x128xf32>
    %47 = arith.addf %46, %45 : vector<16x128xf32>
    %c0_13 = arith.constant 0 : index
    %c0_14 = arith.constant 0 : index
    %48 = vector.load %arg5[%c0_13, %c0_14] : memref<16x128xf32, #tpu.memory_space<vmem>>, vector<16x128xf32>
    tpu.vector_store %arg5[%c0_13, %c0_14], %47 {strides = array<i32>} : memref<16x128xf32, #tpu.memory_space<vmem>>, vector<16x128xf32>,
    %c0_i32_15 = arith.constant 0 : i32
    %49 = arith.cmpi eq, %arg1, %c0_i32_15 : i32
    %50 = arith.extui %49 : i1 to i32
    %c0_i32_16 = arith.constant 0 : i32
    %51 = arith.cmpi ne, %50, %c0_i32_16 : i32
    scf.if %51 {
      %c0_17 = arith.constant 0 : index
      %c0_18 = arith.constant 0 : index
      %52 = vector.load %arg5[%c0_17, %c0_18] : memref<16x128xf32, #tpu.memory_space<vmem>>, vector<16x128xf32>
      %53 = vector.shape_cast %52 : vector<16x128xf32> to vector<2x8x128xf32>
      %cst_19 = arith.constant dense<0.000000e+00> : vector<8x128xf32>
      %54 = vector.multi_reduction <add>, %53, %cst_19 [0] : vector<2x8x128xf32> to vector<8x128xf32>
      %c0_20 = arith.constant 0 : index
      %c0_21 = arith.constant 0 : index
      %55 = vector.load %arg4[%c0_20, %c0_21] : memref<8x128xf32, #tpu.memory_space<vmem>>, vector<8x128xf32>
      tpu.vector_store %arg4[%c0_20, %c0_21], %54 {strides = array<i32>} : memref<8x128xf32, #tpu.memory_space<vmem>>, vector<8x128xf32>,
    } else {
    }
    return
  }
  func.func @transform_0(%arg0: i32, %arg1: i32) -> (i32, i32) {
    %c1_i32 = arith.constant 1 : i32
    %0 = arith.muli %arg0, %c1_i32 : i32
    %1 = arith.addi %0, %arg1 : i32
    %c0_i32 = arith.constant 0 : i32
    %2 = arith.minsi %1, %c0_i32 : i32
    %c0_i32_0 = arith.constant 0 : i32
    %c0_i32_1 = arith.constant 0 : i32
    return %2, %c0_i32_0 : i32, i32
  }
  func.func @transform_1(%arg0: i32, %arg1: i32) -> (i32, i32) {
    %c1_i32 = arith.constant 1 : i32
    %0 = arith.muli %arg0, %c1_i32 : i32
    %1 = arith.addi %0, %arg1 : i32
    %c0_i32 = arith.constant 0 : i32
    %2 = arith.minsi %1, %c0_i32 : i32
    %c0_i32_0 = arith.constant 0 : i32
    %c0_i32_1 = arith.constant 0 : i32
    return %2, %c0_i32_0 : i32, i32
  }
  func.func @transform_2(%arg0: i32, %arg1: i32) -> (i32, i32) {
    %c0_i32 = arith.constant 0 : i32
    %c0_i32_0 = arith.constant 0 : i32
    return %arg0, %c0_i32 : i32, i32
  }
}

</mosaic_0001>

<bundles_post_ra>
// kernel: tpu_custom_call.1
= control target key start
LH: loop header
LB: loop body
LE: loop exit
PB: predicated region body
PF: predicated region fallthrough
CT: control target
= control target key end

     0   :  { %7 = vsyncpa [#allocation4], 0  ;;  %s979_s0 = inlined_call_operand.hbm [shape: f32[16,128], index: 0, kind: input, shape index: {}]   ;;  %s980_s1 = inlined_call_operand.hbm [shape: f32[16,128], index: 1, kind: input, shape index: {}]   ;;  %s981_s2 = inlined_call_operand.hbm [shape: f32[16,128], index: 2, kind: output, shape index: {}]  }
   0x1   :  { %9 = vsyncpa [#allocation4 + $0x1], 0 }
   0x2   :  { %10 = vsyncpa [#allocation7], 0 }
   0x3   :  { %12 = vsyncpa [#allocation7 + $0x1], 0 }
   0x4   :  { %13 = vsyncpa [#allocation5], 0 }
   0x5   :  { %15 = vsyncpa [#allocation5 + $0x1], 0  ;;  %s757_s9 = smov 0   ;;  %s759_s10 = smov 0  }
   0x6   :  { %s761_s11 = smov 0   ;;  %s763_s12 = smov 0  }
   0x7   :  { %s765_s13 = smov 0   ;;  %s767_s14 = smov 0  }
   0x8   :  { %s769_s15 = smov 0   ;;  %s771_s16 = smov 0  }
   0x9 LB: > { %s442_s17 = sadd.s32 4294967295, %s735_s16   ;;  %s443_s18 = sadd.s32 4294967294, %s735_s16   ;;  %s735_s16 = sphi %s771_s16, %s21_s16   ;;  %s731_s15 = sphi %s769_s15, %s1000_s15   ;;  %s727_s14 = sphi %s767_s14, %s999_s14   ;;  %s723_s13 = sphi %s765_s13, %s969_s13   ;;  %s719_s12 = sphi %s763_s12, %s998_s12   ;;  %s715_s11 = sphi %s761_s11, %s997_s11   ;;  %s711_s10 = sphi %s759_s10, %s996_s10   ;;  %s707_s9 = sphi %s757_s9, %s995_s9  }
   0xa   : > { %s33_s19 = sadd.s32 1, %s731_s15  ;;  %p704_p1 = scmp.ne.s32.totalorder %s723_s13, 0 }
   0xb   : > { %p35_p0 = scmp.ge.s32.totalorder %s33_s19, 2  ;;  %p54_p2 = scmp.eq.s32.totalorder %s735_s16, 0 }
   0xc   : > { %p59_p3 = scmp.ne.s32.totalorder %s723_s13, %s719_s12  ;;  %p60_p5 = scmp.eq.s32.totalorder %s442_s17, 0 }
   0xd   : > { %s1002_s19 = smov (%p35_p0, %s33_s19), 0  ;;  %p803_p4 = por %p704_p1, %p54_p2 }
   0xe   : > { %p807_p6 = por %p60_p5, %p59_p3  ;;  %s101_s22 = ssub.s32 %s731_s15, %s1002_s19 }
   0xf   : > { %p102_p7 = scmp.eq.s32.totalorder %s101_s22, 0  ;;  %s104_s23 = sadd.s32 1, %s715_s11 }
  0x10   : > { %s985_s21 = scalar_select %p807_p6, 1, 0 }
  0x11   : > { %s815_s24 = scalar_select %p102_p7, %s715_s11, %s104_s23  }
  0x12   : > { %p114_p8 = scmp.ne.s32.totalorder %s715_s11, %s711_s10  ;;  %p115_p9 = scmp.eq.s32.totalorder %s442_s17, 1 }
  0x13   : > { %p120_p10 = scmp.ne.s32.totalorder %s711_s10, %s707_s9  ;;  %p121_p11 = scmp.eq.s32.totalorder %s443_s18, 1 }
  0x14   : > { %p821_p12 = por %p115_p9, %p114_p8  ;;  %p480_p1 = scmp.lt.s32.totalorder %s735_s16, 2 }
  0x15   : > { %p826_p0 = por %p121_p11, %p120_p10  ;;  %s737_s27 = smov [#allocation3]  }
  0x16   : > { %s986_s25 = scalar_select %p821_p12, 1, 0 }
  0x17   : > { %s987_s26 = scalar_select %p826_p0, 1, 0 }
  0x18   : > { %s155_s28 = sshll.u32 %s737_s27, 4  ;;  %p833_p2 = pnand %p480_p1, %p803_p4  ;;  %s156_s28 = int_to_ptr.vmem [resolvable:$true] %s155_s28 }
  0x19   : > { %s568_s4 = scalar_lea.hbm %s979_s0, 256 }
  0x1a   : > { %p569_p3 = scmp.ne.s32.totalorder %s979_s0, %s568_s4  ;;  %p570_p5 = pneg %p833_p2 }
  0x1b   : > { %p575_p8 = scmp.lt.u32.totalorder %s568_s4, %s568_s4  ;;  %p577_p9 = scmp.lt.u32.totalorder %s568_s4, %s979_s0 }
  0x1c   : > { %p571_p7 = pnand %p570_p5, %p569_p3 }
  0x1d   : > { %p578_p10 = por %p577_p9, %p575_p8 }
  0x1e   : > { %p572_p4 = pneg %p571_p7 }
  0x20   : > { %p579_p11 = pnand %p578_p10, %p572_p4 }
  0x22   : > { %582 = shalt.err (!%p579_p11)
}
  0x23   : > { %s583_s12 = scalar_lea.vmem %s156_s28, 256  ;;  %s590_s17 = scalar_lea.vmem %s156_s28, 512 }
  0x24   : > { %p584_p1 = scmp.ne.s32.totalorder %s156_s28, %s583_s12  ;;  %p591_p12 = scmp.lt.s32.totalorder %s156_s28, %s156_s28 }
  0x25   : > { %p592_p6 = scmp.lt.s32.totalorder %s590_s17, %s583_s12 }
  0x26   : > { %p586_p13 = pnand %p584_p1, %p570_p5 }
  0x27   : > { %p593_p3 = por %p592_p6, %p591_p12 }
  0x28   : > { %p587_p0 = pneg %p586_p13 }
  0x2a   : > { %p594_p7 = pnand %p593_p3, %p587_p0 }
  0x2c   : > { %597 = shalt.err (!%p594_p7)
}
  0x2d   : > { %s738_s18 = smov 128   ;;  %s739_s20 = smov 8  }
  0x2e   : > { %472 = dma.hbm_to_vmem [thread:$0]  (!%p833_p2), %s979_s0, 256, %s156_s28, [#allocation4], %s738_s18, %s738_s18, %s739_s20  }
  0x2f   : > { %p452_p13 = scmp.ge.s32.totalorder %s735_s16, 1  ;;  %p187_p4 = scmp.lt.s32.totalorder %s735_s16, 3 }
  0x30   : > { %s740_s30 = smov [#allocation6]   ;;  %s598_s6 = scalar_lea.hbm %s980_s1, 256 }
  0x31   : > { %p864_p8 = pnand %p452_p13, %p187_p4  ;;  %s179_s3 = sshll.u32 %s740_s30, 4  ;;  %s180_s3 = int_to_ptr.vmem [resolvable:$true] %s179_s3 }
  0x32   : > { %p599_p6 = scmp.ne.s32.totalorder %s980_s1, %s598_s6  ;;  %p605_p9 = scmp.lt.u32.totalorder %s598_s6, %s598_s6 }
  0x33   : > { %s989_s27 = scalar_select %p864_p8, 1, 0 }
  0x34   : > { %p601_p12 = pnand %p599_p6, %p570_p5  ;;  %p607_p10 = scmp.lt.u32.totalorder %s598_s6, %s980_s1 }
  0x36   : > { %p602_p0 = pneg %p601_p12  ;;  %p608_p11 = por %p607_p10, %p605_p9 }
  0x38   : > { %p609_p1 = pnand %p608_p11, %p602_p0 }
  0x3a   : > { %612 = shalt.err (!%p609_p1)
}
  0x3b   : > { %s613_s17 = scalar_lea.vmem %s180_s3, 256  ;;  %s620_s22 = scalar_lea.vmem %s180_s3, 512 }
  0x3c   : > { %p614_p3 = scmp.ne.s32.totalorder %s180_s3, %s613_s17  ;;  %p621_p4 = scmp.lt.s32.totalorder %s180_s3, %s180_s3 }
  0x3d   : > { %p622_p8 = scmp.lt.s32.totalorder %s620_s22, %s613_s17 }
  0x3e   : > { %p616_p7 = pnand %p614_p3, %p570_p5 }
  0x3f   : > { %p623_p6 = por %p622_p8, %p621_p4 }
  0x40   : > { %p617_p13 = pneg %p616_p7 }
  0x42   : > { %p624_p12 = pnand %p623_p6, %p617_p13 }
  0x44   : > { %627 = shalt.err (!%p624_p12)
}
  0x45   : > { %475 = dma.hbm_to_vmem [thread:$0]  (!%p833_p2), %s980_s1, 256, %s180_s3, [#allocation7], %s738_s18, %s738_s18, %s739_s20  }
  0x46   : > { %p990_p0 = scmp.ne.s32.totalorder %s989_s27, 0 }
  0x47   : > { %s193_s4 = sand.u32 (!%p990_p0), 1, %s723_s13   ;;  %p991_p5 = scmp.ne.s32.totalorder (!%p990_p0), %s985_s21, 0 }
  0x48   : > { %191 = sbr.rel (%p990_p0) target bundleno = 160 (0xa0), region = 28  ;;  %s453_s5 = sshll.u32 (!%p990_p0), %s193_s4, 4 }
  0x49   : > { %s194_s6 = scalar_lea.sflag (!%p990_p0), [#allocation4], %s193_s4  ;;  %s197_s7 = scalar_lea.vmem (!%p990_p0), [#allocation3], %s453_s5 }
  0x4f   : > { %693 = dma.done.wait (%p991_p5), %s194_s6, 256  }
  0x50   : > { %695 = vsyncadd (%p991_p5), %s194_s6, 4294967040  ;;  %s203_s29 = scalar_lea.sflag [#allocation7], %s193_s4  ;;  %s898_s8 = scalar_lea.vmem [#allocation6], %s453_s5 }
  0x51   : > { %697 = dma.done.wait (%p991_p5), %s203_s29, 256  }
  0x52   : > { %699 = vsyncadd (%p991_p5), %s203_s29, 4294967040  ;;  %v904_v0 = vld [vmem:[%s197_s7] sm:$0xff]  ;;  %v906_v1 = vld [vmem:[%s197_s7 + $0x8] sm:$0xff]  ;;  %v297_v20 = vlaneseq  ;;  %s456_s21 = sshll.u32 %s727_s14, 4  ;;  %s229_s18 = sand.u32 1, %s711_s10  }
  0x53   : > { %v250_v2 = vand.u32 2147483647, %v904_v0  ;;  %v251_v3 = vand.u32 2147483647, %v906_v1  ;;  %v258_v12 = vmin.f32 %v904_v0, 0.0  ;;  %v259_v14 = vmin.f32 %v906_v1, 0.0 }
  0x54   : > { %v298_v23 = vshrl.u32 %v297_v20, 7  ;;  %v303_v25 = vstv %s456_s21  ;;  %v248_v26 = vld [vmem:[%s898_s8] sm:$0xff]  ;;  %v249_v28 = vld [vmem:[%s898_s8 + $0x8] sm:$0xff]  ;;  %v301_v35 = vand.u32 127, %v297_v20  ;;  %s455_s20 = sshll.u32 %s229_s18, 3  ;;  %s458_s28 = sshll.u32 %s727_s14, 7 }
  0x55   : > { %v252_v4 = vsub.f32 0.0, %v250_v2  ;;  %v253_v5 = vsub.f32 0.0, %v251_v3  ;;  %v288_v34 = vsub.f32 1.0, %v248_v26  ;;  %v289_v38 = vsub.f32 1.0, %v249_v28  ;;  %s231_s27 = scalar_lea.vmem [#allocation8], %s455_s20  ;;  %s926_s22 = scalar_lea.hbm %s981_s2, %s458_s28 }
  0x56   : > { %v299_v24 = vadd.s32 8, %v298_v23  ;;  %v304_v27 = vadd.s32 %v303_v25, %v298_v23  ;;  %s341_s3 = sshll.u32 %s231_s27, 4  ;;  %s328_s23 = scalar_lea.sflag [#allocation5], %s229_s18  ;;  %s921_s3 = int_to_ptr.vmem [resolvable:$true] %s341_s3 }
  0x57   : > { %v254_v6 = vmul.f32 1.442695, %v252_v4  ;;  %v256_v7 = vmul.f32 1.442695, %v253_v5  ;;  %s628_s30 = scalar_lea.vmem %s921_s3, 128  ;;  %p992_p8 = scmp.ne.s32.totalorder %s986_s25, 0 }
  0x58   : > { %v305_v29 = vadd.s32 %v303_v25, %v299_v24  ;;  %v306_v39 = vmul.u32 128, %v304_v27  ;;  %p629_p2 = scmp.ne.s32.totalorder %s921_s3, %s628_s30  ;;  %s741_s14 = smov [#allocation8]  }
  0x59   : > { %556 = vpow2.f32 %v254_v6  ;;  %s632_s4 = sshll.u32 %s741_s14, 4  ;;  %s633_s4 = int_to_ptr.vmem [resolvable:$false] %s632_s4 }
  0x5a   : > { %558 = vpow2.f32 %v256_v7  ;;  %v307_v43 = vmul.u32 128, %v305_v29  ;;  %v308_v51 = vadd.s32 %v306_v39, %v301_v35  ;;  %p630_p9 = pnand %p629_p2, %p992_p8  ;;  %s634_s5 = scalar_lea.vmem %s633_s4, 256 }
  0x5b   : > { %p635_p11 = scmp.lt.s32.totalorder %s921_s3, %s633_s4  ;;  %p636_p1 = scmp.lt.s32.totalorder %s634_s5, %s628_s30 }
  0x5c   : > { %v309_v54 = vadd.s32 %v307_v43, %v301_v35  ;;  %vm310_vm0 = vcmp.lt.s32.totalorder %v308_v51, 2048  ;;  %p631_p10 = pneg %p630_p9 }
  0x5d   : > { %p637_p3 = por %p636_p1, %p635_p11 }
  0x5e   : > { %vm311_vm1 = vcmp.lt.s32.totalorder %v309_v54, 2048 }
  0x5f   : > { %p638_p7 = pnand %p637_p3, %p631_p10 }
  0x63   : > { %v557_v8 = vpop.eup %556 }
  0x64   : > { %v559_v9 = vpop.eup %558  ;;  %v260_v10 = vadd.f32 1.0, %v557_v8 }
  0x65   : > { %v261_v11 = vadd.f32 1.0, %v559_v9 }
  0x66   : > { %560 = vlog2.f32 %v260_v10 }
  0x67   : > { %562 = vlog2.f32 %v261_v11 }
  0x70   : > { %v561_v13 = vpop.eup %560 }
  0x71   : > { %v563_v15 = vpop.eup %562  ;;  %v263_v16 = vmul.f32 0.6931472, %v561_v13 }
  0x72   : > { %v265_v17 = vmul.f32 0.6931472, %v563_v15 }
  0x73   : > { %v266_v18 = vsub.f32 %v258_v12, %v263_v16 }
  0x74   : > { %v267_v19 = vsub.f32 %v259_v14, %v265_v17 }
  0x75   : > { %v270_v21 = vmul.f32 1.442695, %v266_v18  ;;  %v268_v40 = vsub.f32 %v266_v18, %v904_v0 }
  0x76   : > { %v272_v22 = vmul.f32 1.442695, %v267_v19  ;;  %v269_v44 = vsub.f32 %v267_v19, %v906_v1 }
  0x77   : > { %564 = vpow2.f32 %v270_v21 }
  0x78   : > { %566 = vpow2.f32 %v272_v22 }
  0x81   : > { %v565_v30 = vpop.eup %564 }
  0x82   : > { %v567_v31 = vpop.eup %566  ;;  %v274_v32 = vsub.f32 1.0, %v565_v30  ;;  %v278_v33 = vmul.f32 %v565_v30, %v565_v30 }
  0x83   : > { %v275_v36 = vsub.f32 1.0, %v567_v31  ;;  %v279_v37 = vmul.f32 %v567_v31, %v567_v31 }
  0x84   : > { %v276_v41 = vmul.f32 %v274_v32, %v274_v32  ;;  %v286_v42 = vmul.f32 0.75, %v278_v33 }
  0x85   : > { %v277_v45 = vmul.f32 %v275_v36, %v275_v36  ;;  %v287_v46 = vmul.f32 0.75, %v279_v37 }
  0x86   : > { %v280_v47 = vmul.f32 -0.25, %v276_v41  ;;  %v290_v48 = vmul.f32 %v288_v34, %v286_v42 }
  0x87   : > { %v281_v49 = vmul.f32 -0.25, %v277_v45  ;;  %v291_v50 = vmul.f32 %v289_v38, %v287_v46 }
  0x88   : > { %v282_v52 = vmul.f32 %v280_v47, %v248_v26  ;;  %v292_v53 = vmul.f32 %v290_v48, %v268_v40 }
  0x89   : > { %v283_v55 = vmul.f32 %v281_v49, %v249_v28  ;;  %v293_v56 = vmul.f32 %v291_v50, %v269_v44 }
  0x8a   : > { %v284_v57 = vmul.f32 %v282_v52, %v266_v18 }
  0x8b   : > { %v285_v58 = vmul.f32 %v283_v55, %v267_v19 }
  0x8c   : > { %v294_v59 = vsub.f32 %v284_v57, %v292_v53 }
  0x8d   : > { %v295_v60 = vsub.f32 %v285_v58, %v293_v56 }
  0x8e   : > { %v312_v61 = vsel %vm310_vm0, %v294_v59, 0.0 }
  0x8f   : > { %v313_v62 = vsel %vm311_vm1, %v295_v60, 0.0 }
  0x90   : > { %v325_v63 = vadd.f32 %v313_v62, %v312_v61 }
  0x92   : > { %326 = vst [vmem:[%s231_s27] sm:$0xff] %v325_v63 }
  0x93   : > { %641 = shalt.err (!%p638_p7)
}
  0x94   : > { %s642_s6 = scalar_lea.hbm %s926_s22, 128  ;;  %s646_s8 = scalar_lea.hbm %s981_s2, 256 }
  0x95   : > { %p643_p13 = scmp.ne.s32.totalorder %s926_s22, %s642_s6  ;;  %p647_p12 = scmp.lt.u32.totalorder %s926_s22, %s981_s2 }
  0x96   : > { %p648_p0 = scmp.lt.u32.totalorder %s646_s8, %s642_s6  ;;  %p650_p2 = scmp.lt.u32.totalorder %s642_s6, %s926_s22 }
  0x97   : > { %p644_p4 = pnand %p643_p13, %p992_p8 }
  0x98   : > { %p649_p5 = por %p648_p0, %p647_p12 }
  0x99   : > { %p645_p6 = pneg %p644_p4 }
  0x9a   : > { %p651_p9 = por %p650_p2, %p649_p5 }
  0x9c   : > { %p652_p10 = pnand %p651_p9, %p645_p6 }
  0x9e   : > { %655 = shalt.err (!%p652_p10)
}
  0x9f   : > { %467 = dma.vmem_to_hbm [thread:$0]  (%p992_p8), %s921_s3, 128, %s926_s22, %s328_s23  }
  0xa0 PF: > { %s353_s20 = sand.u32 1, %s707_s9   ;;  %p993_p11 = scmp.ne.s32.totalorder %s987_s26, 0 }
  0xa1   : > { %p994_p1 = scmp.ge.s32.totalorder %s735_s16, 2  ;;  %s354_s27 = scalar_lea.sflag [#allocation5], %s353_s20 }
  0xa3   : > { %p477_p3 = pnand %p994_p1, %p993_p11 }
  0xa5   : > { %701 = dma.done.wait (!%p477_p3), %s354_s27, 128  }
  0xa6   : > { %703 = vsyncadd (!%p477_p3), %s354_s27, 4294967168  ;;  %s21_s16 = sadd.s32 1, %s735_s16   ;;  %s995_s9 = smov %s711_s10 }
  0xa7   : > { %p18_p7 = scmp.ge.s32.totalorder %s21_s16, 4   ;;  %s996_s10 = smov %s715_s11 }
  0xa8   : > { %s997_s11 = smov %s815_s24  ;;  %s998_s12 = smov %s723_s13 }
  0xa9   : > { %s969_s13 = smov 0   ;;  %s999_s14 = smov %s731_s15 }
  0xaa   : > { %s1000_s15 = smov %s1002_s19  ;;  %20 = sbr.rel (!%p18_p7) target bundleno = 9 (0x9), region = 94 }
  0xb1   :  { %359 = vsyncpa [#allocation4], 1 }
  0xb2   :  { %361 = vsyncpa [#allocation4 + $0x1], 1 }
  0xb3   :  { %362 = vsyncpa [#allocation7], 1 }
  0xb4   :  { %364 = vsyncpa [#allocation7 + $0x1], 1 }
  0xb5   :  { %365 = vsyncpa [#allocation5], 1 }
  0xb6   :  { %367 = vsyncpa [#allocation5 + $0x1], 1 }

</bundles_post_ra>
